<compile_context>
chip_gen: v6e
topology: v6e:2x2x1
jax: 0.10.0
libtpu: 0.0.40
codegen_flags: <defaults>
</compile_context>

<pallas_src>
import numpy as np
import jax
import jax.numpy as jnp
from jax import lax
from jax.experimental import pallas as pl
from jax.experimental.pallas import tpu as pltpu

B = 2            # batch
L = 6            # sequence length (6 csv features)
C1 = 64          # conv1 out channels
C1P = 128        # conv1 channel block padded to lane width (keeps slices aligned)
C2 = 128         # conv2 out channels
H = 128          # fc1 hidden
NOUT = 6         # classes
LP = L + 2       # conv-padded length (positions 0 and 7 are the zero pad)
NPAD = 128       # lane-padded output width of the final projection


def mynet_kernel(x_ref, w1_ref, b1_ref, w2_ref, b2_ref,
                 wf1_ref, bf1_ref, wf2_ref, bf2_ref, o_ref):
    # conv1 as (B,6) x (6, LP*C1P) banded matmul + ReLU.  Pad positions (lp=0,7)
    # and pad channels (c=64..127) have zero weights and zero bias, so ReLU
    # keeps them exactly 0.
    h1 = jnp.dot(x_ref[...], w1_ref[...], preferred_element_type=jnp.float32)
    h1 = jnp.maximum(h1 + b1_ref[...], 0.0)                       # (B, LP*C1P)

    # conv2: exploit the band structure -- one dense (3*C1P, C2) kernel held in
    # VMEM, 6 lane-aligned position dots into disjoint 128-wide output blocks.
    w2 = w2_ref[...]
    b2 = b2_ref[...]
    blocks = [
        jnp.dot(h1[:, l * C1P:(l + 3) * C1P], w2,
                preferred_element_type=jnp.float32) + b2
        for l in range(L)
    ]
    h2 = jnp.maximum(jnp.concatenate(blocks, axis=-1), 0.0)       # (B, L*C2) position-major

    # fc1 + ReLU -> (B, H); single wide-K (K=768) matmul.
    h3 = jnp.dot(h2, wf1_ref[...], preferred_element_type=jnp.float32)
    h3 = jnp.maximum(h3 + bf1_ref[...], 0.0)

    # fc2 (lane-padded to 128 outputs) -> (B, 128) lane-dense store.
    o_ref[...] = jnp.dot(h3, wf2_ref[...],
                         preferred_element_type=jnp.float32) + bf2_ref[...]


def prepare_params(params):
    """One-time weight restructuring (numpy; hoisted out of the per-call path)."""
    w1, b1, w2, b2, wfc1, bfc1, wfc2, bfc2 = (np.asarray(p, np.float32) for p in params)

    # conv1 -> (L, LP*C1P) banded matrix producing the zero-padded, position-major
    # conv1 activation flat[lp*C1P + c] (lp = 0..7; lp 0/7 and c >= 64 stay zero).
    w1f = np.zeros((L, LP * C1P), np.float32)
    b1f = np.zeros((1, LP * C1P), np.float32)
    for lp in range(1, L + 1):                       # valid output positions
        b1f[0, lp * C1P: lp * C1P + C1] = b1
        for k in range(3):
            j = lp + k - 2                           # input position
            if 0 <= j < L:
                w1f[j, lp * C1P: lp * C1P + C1] = w1[:, 0, k]

    # conv2 -> dense per-window kernel (3*C1P, C2); row index k*C1P + cin.
    w2d = np.zeros((3 * C1P, C2), np.float32)
    for k in range(3):
        w2d[k * C1P: k * C1P + C1, :] = w2[:, :, k].T          # (cin, cout)
    b2f = b2.reshape(1, C2)

    # fc1: PyTorch flatten is channel-major (c*L + l); kernel layout is
    # position-major (l*C2 + c) -> permute to (768, 128) accordingly.
    wf1 = np.transpose(wfc1.T.reshape(C2, L, H), (1, 0, 2)).reshape(L * C2, H)
    bf1 = bfc1.reshape(1, H)

    # fc2: zero-pad to lane width 128 for a lane-dense output store.
    wf2 = np.zeros((H, NPAD), np.float32)
    wf2[:, :NOUT] = wfc2.T
    bf2 = np.zeros((1, NPAD), np.float32)
    bf2[0, :NOUT] = bfc2

    # Weights in bf16 (halves the dominant HBM->VMEM DMA); biases stay f32.
    return (jnp.asarray(w1f, jnp.bfloat16), jnp.asarray(b1f, jnp.float32),
            jnp.asarray(w2d, jnp.bfloat16), jnp.asarray(b2f, jnp.float32),
            jnp.asarray(wf1, jnp.bfloat16), jnp.asarray(bf1, jnp.float32),
            jnp.asarray(wf2, jnp.bfloat16), jnp.asarray(bf2, jnp.float32))


@jax.jit
def mynet_forward(x, prepped):
    """x: (B, 1, L) float32 (PyTorch NCL). Returns (B, NOUT)."""
    x2d = x[:, 0, :]                                             # (B, 6), no pad op
    vspec = pl.BlockSpec(memory_space=pltpu.MemorySpace.VMEM)
    out = pl.pallas_call(
        mynet_kernel,
        out_shape=jax.ShapeDtypeStruct((x.shape[0], NPAD), jnp.float32),
        in_specs=[vspec] * 9,
        out_specs=vspec,
    )(x2d, *prepped)
    return out[:, :NOUT]


def init_params(key):
    """Deterministic PyTorch-style uniform(-1/sqrt(fan_in), +) init."""
    ks = jax.random.split(key, 8)

    def u(k, shape, fan_in):
        bound = 1.0 / (fan_in ** 0.5)
        return jax.random.uniform(k, shape, jnp.float32, -bound, bound)

    w1 = u(ks[0], (C1, 1, 3), 1 * 3)          # conv1.weight
    b1 = u(ks[1], (C1,), 1 * 3)
    w2 = u(ks[2], (C2, C1, 3), C1 * 3)        # conv2.weight
    b2 = u(ks[3], (C2,), C1 * 3)
    wfc1 = u(ks[4], (H, C2 * L), C2 * L)      # fc1.weight (128, 768)
    bfc1 = u(ks[5], (H,), C2 * L)
    wfc2 = u(ks[6], (NOUT, H), H)             # fc2.weight (6, 128)
    bfc2 = u(ks[7], (NOUT,), H)
    return (w1, b1, w2, b2, wfc1, bfc1, wfc2, bfc2)


def quantize_weights_like_kernel(params):
    """Round weights (not biases) through bf16, matching the kernel's storage."""
    w1, b1, w2, b2, wfc1, bfc1, wfc2, bfc2 = params
    q = lambda w: w.astype(jnp.bfloat16).astype(jnp.float32)
    return (q(w1), b1, q(w2), b2, q(wfc1), bfc1, q(wfc2), bfc2)


def reference_forward(x, params):
    """Pure-JAX reference matching PyTorch semantics (for validation)."""
    (w1, b1, w2, b2, wfc1, bfc1, wfc2, bfc2) = params
    dn = ('NCH', 'OIH', 'NCH')
    h = lax.conv_general_dilated(x, w1, (1,), ((1, 1),), dimension_numbers=dn)
    h = jnp.maximum(h + b1[None, :, None], 0.0)
    h = lax.conv_general_dilated(h, w2, (1,), ((1, 1),), dimension_numbers=dn)
    h = jnp.maximum(h + b2[None, :, None], 0.0)
    h = h.reshape(h.shape[0], -1)                                # (B, 768) channel-major
    h = jnp.maximum(h @ wfc1.T + bfc1, 0.0)
    return h @ wfc2.T + bfc2


if __name__ == "__main__":
    key = jax.random.PRNGKey(0)
    kx, kp = jax.random.split(key)
    x = jax.random.normal(kx, (B, 1, L), jnp.float32)            # PyTorch NCL input
    params = init_params(kp)
    prepped = prepare_params(params)                             # one-time weight prep

    out = jax.block_until_ready(mynet_forward(x, prepped))
    # Validate against an f32 reference using the same bf16-rounded weights,
    # so the only difference is f32 accumulation order.
    ref = jax.block_until_ready(
        reference_forward(x, quantize_weights_like_kernel(params)))

    assert out.shape == (B, NOUT)
    assert jnp.allclose(out, ref, atol=2e-3, rtol=2e-3), (out, ref)
    print("KERNEL_OK")
</pallas_src>

<mosaic_0001>
module attributes {stable_mosaic.version = 11 : i64} {
  func.func @mynet_kernel(%arg0: memref<2x6xf32, #tpu.memory_space<vmem>>, %arg1: memref<6x1024xbf16, #tpu.memory_space<vmem>>, %arg2: memref<1x1024xf32, #tpu.memory_space<vmem>>, %arg3: memref<384x128xbf16, #tpu.memory_space<vmem>>, %arg4: memref<1x128xf32, #tpu.memory_space<vmem>>, %arg5: memref<768x128xbf16, #tpu.memory_space<vmem>>, %arg6: memref<1x128xf32, #tpu.memory_space<vmem>>, %arg7: memref<128x128xbf16, #tpu.memory_space<vmem>>, %arg8: memref<1x128xf32, #tpu.memory_space<vmem>>, %arg9: memref<2x128xf32, #tpu.memory_space<vmem>>) attributes {dimension_semantics = [], scalar_prefetch = 0 : i64, scratch_operands = 0 : i64, tpu.core_type = #tpu.core_type<tc>} {
    %c0 = arith.constant 0 : index
    %c0_0 = arith.constant 0 : index
    %0 = vector.load %arg0[%c0, %c0_0] : memref<2x6xf32, #tpu.memory_space<vmem>>, vector<2x6xf32>
    %c0_1 = arith.constant 0 : index
    %c0_2 = arith.constant 0 : index
    %1 = vector.load %arg1[%c0_1, %c0_2] : memref<6x1024xbf16, #tpu.memory_space<vmem>>, vector<6x1024xbf16>
    %cst = arith.constant dense<0.000000e+00> : vector<2x1024xf32>
    %2 = tpu.matmul %0, %1, %cst {dimension_numbers = #tpu.dot_dimension_numbers<[1], [0], [0], [1], [0, 0, 1, 1], [], []>} : vector<2x6xf32>, vector<6x1024xbf16>, vector<2x1024xf32> -> vector<2x1024xf32>
    %c0_3 = arith.constant 0 : index
    %c0_4 = arith.constant 0 : index
    %3 = vector.load %arg2[%c0_3, %c0_4] : memref<1x1024xf32, #tpu.memory_space<vmem>>, vector<1x1024xf32>
    %4 = vector.broadcast %3 : vector<1x1024xf32> to vector<2x1024xf32>
    %5 = arith.addf %2, %4 : vector<2x1024xf32>
    %cst_5 = arith.constant 0.000000e+00 : f32
    %6 = vector.broadcast %cst_5 : f32 to vector<2x1024xf32>
    %7 = arith.maximumf %5, %6 : vector<2x1024xf32>
    %c0_6 = arith.constant 0 : index
    %c0_7 = arith.constant 0 : index
    %8 = vector.load %arg3[%c0_6, %c0_7] : memref<384x128xbf16, #tpu.memory_space<vmem>>, vector<384x128xbf16>
    %c0_8 = arith.constant 0 : index
    %c0_9 = arith.constant 0 : index
    %9 = vector.load %arg4[%c0_8, %c0_9] : memref<1x128xf32, #tpu.memory_space<vmem>>, vector<1x128xf32>
    %10 = vector.extract_strided_slice %7 {offsets = [0, 0], sizes = [2, 384], strides = [1, 1]} : vector<2x1024xf32> to vector<2x384xf32>
    %cst_10 = arith.constant dense<0.000000e+00> : vector<2x128xf32>
    %11 = tpu.matmul %10, %8, %cst_10 {dimension_numbers = #tpu.dot_dimension_numbers<[1], [0], [0], [1], [0, 0, 1, 1], [], []>} : vector<2x384xf32>, vector<384x128xbf16>, vector<2x128xf32> -> vector<2x128xf32>
    %12 = vector.broadcast %9 : vector<1x128xf32> to vector<2x128xf32>
    %13 = arith.addf %11, %12 : vector<2x128xf32>
    %14 = vector.extract_strided_slice %7 {offsets = [0, 128], sizes = [2, 384], strides = [1, 1]} : vector<2x1024xf32> to vector<2x384xf32>
    %cst_11 = arith.constant dense<0.000000e+00> : vector<2x128xf32>
    %15 = tpu.matmul %14, %8, %cst_11 {dimension_numbers = #tpu.dot_dimension_numbers<[1], [0], [0], [1], [0, 0, 1, 1], [], []>} : vector<2x384xf32>, vector<384x128xbf16>, vector<2x128xf32> -> vector<2x128xf32>
    %16 = vector.broadcast %9 : vector<1x128xf32> to vector<2x128xf32>
    %17 = arith.addf %15, %16 : vector<2x128xf32>
    %18 = vector.extract_strided_slice %7 {offsets = [0, 256], sizes = [2, 384], strides = [1, 1]} : vector<2x1024xf32> to vector<2x384xf32>
    %cst_12 = arith.constant dense<0.000000e+00> : vector<2x128xf32>
    %19 = tpu.matmul %18, %8, %cst_12 {dimension_numbers = #tpu.dot_dimension_numbers<[1], [0], [0], [1], [0, 0, 1, 1], [], []>} : vector<2x384xf32>, vector<384x128xbf16>, vector<2x128xf32> -> vector<2x128xf32>
    %20 = vector.broadcast %9 : vector<1x128xf32> to vector<2x128xf32>
    %21 = arith.addf %19, %20 : vector<2x128xf32>
    %22 = vector.extract_strided_slice %7 {offsets = [0, 384], sizes = [2, 384], strides = [1, 1]} : vector<2x1024xf32> to vector<2x384xf32>
    %cst_13 = arith.constant dense<0.000000e+00> : vector<2x128xf32>
    %23 = tpu.matmul %22, %8, %cst_13 {dimension_numbers = #tpu.dot_dimension_numbers<[1], [0], [0], [1], [0, 0, 1, 1], [], []>} : vector<2x384xf32>, vector<384x128xbf16>, vector<2x128xf32> -> vector<2x128xf32>
    %24 = vector.broadcast %9 : vector<1x128xf32> to vector<2x128xf32>
    %25 = arith.addf %23, %24 : vector<2x128xf32>
    %26 = vector.extract_strided_slice %7 {offsets = [0, 512], sizes = [2, 384], strides = [1, 1]} : vector<2x1024xf32> to vector<2x384xf32>
    %cst_14 = arith.constant dense<0.000000e+00> : vector<2x128xf32>
    %27 = tpu.matmul %26, %8, %cst_14 {dimension_numbers = #tpu.dot_dimension_numbers<[1], [0], [0], [1], [0, 0, 1, 1], [], []>} : vector<2x384xf32>, vector<384x128xbf16>, vector<2x128xf32> -> vector<2x128xf32>
    %28 = vector.broadcast %9 : vector<1x128xf32> to vector<2x128xf32>
    %29 = arith.addf %27, %28 : vector<2x128xf32>
    %30 = vector.extract_strided_slice %7 {offsets = [0, 640], sizes = [2, 384], strides = [1, 1]} : vector<2x1024xf32> to vector<2x384xf32>
    %cst_15 = arith.constant dense<0.000000e+00> : vector<2x128xf32>
    %31 = tpu.matmul %30, %8, %cst_15 {dimension_numbers = #tpu.dot_dimension_numbers<[1], [0], [0], [1], [0, 0, 1, 1], [], []>} : vector<2x384xf32>, vector<384x128xbf16>, vector<2x128xf32> -> vector<2x128xf32>
    %32 = vector.broadcast %9 : vector<1x128xf32> to vector<2x128xf32>
    %33 = arith.addf %31, %32 : vector<2x128xf32>
    %34 = tpu.concatenate %13, %17, %21, %25, %29, %33 in 1 : vector<2x128xf32>, vector<2x128xf32>, vector<2x128xf32>, vector<2x128xf32>, vector<2x128xf32>, vector<2x128xf32> -> vector<2x768xf32>
    %cst_16 = arith.constant 0.000000e+00 : f32
    %35 = vector.broadcast %cst_16 : f32 to vector<2x768xf32>
    %36 = arith.maximumf %34, %35 : vector<2x768xf32>
    %c0_17 = arith.constant 0 : index
    %c0_18 = arith.constant 0 : index
    %37 = vector.load %arg5[%c0_17, %c0_18] : memref<768x128xbf16, #tpu.memory_space<vmem>>, vector<768x128xbf16>
    %cst_19 = arith.constant dense<0.000000e+00> : vector<2x128xf32>
    %38 = tpu.matmul %36, %37, %cst_19 {dimension_numbers = #tpu.dot_dimension_numbers<[1], [0], [0], [1], [0, 0, 1, 1], [], []>} : vector<2x768xf32>, vector<768x128xbf16>, vector<2x128xf32> -> vector<2x128xf32>
    %c0_20 = arith.constant 0 : index
    %c0_21 = arith.constant 0 : index
    %39 = vector.load %arg6[%c0_20, %c0_21] : memref<1x128xf32, #tpu.memory_space<vmem>>, vector<1x128xf32>
    %40 = vector.broadcast %39 : vector<1x128xf32> to vector<2x128xf32>
    %41 = arith.addf %38, %40 : vector<2x128xf32>
    %cst_22 = arith.constant 0.000000e+00 : f32
    %42 = vector.broadcast %cst_22 : f32 to vector<2x128xf32>
    %43 = arith.maximumf %41, %42 : vector<2x128xf32>
    %c0_23 = arith.constant 0 : index
    %c0_24 = arith.constant 0 : index
    %44 = vector.load %arg7[%c0_23, %c0_24] : memref<128x128xbf16, #tpu.memory_space<vmem>>, vector<128x128xbf16>
    %cst_25 = arith.constant dense<0.000000e+00> : vector<2x128xf32>
    %45 = tpu.matmul %43, %44, %cst_25 {dimension_numbers = #tpu.dot_dimension_numbers<[1], [0], [0], [1], [0, 0, 1, 1], [], []>} : vector<2x128xf32>, vector<128x128xbf16>, vector<2x128xf32> -> vector<2x128xf32>
    %c0_26 = arith.constant 0 : index
    %c0_27 = arith.constant 0 : index
    %46 = vector.load %arg8[%c0_26, %c0_27] : memref<1x128xf32, #tpu.memory_space<vmem>>, vector<1x128xf32>
    %47 = vector.broadcast %46 : vector<1x128xf32> to vector<2x128xf32>
    %48 = arith.addf %45, %47 : vector<2x128xf32>
    %c0_28 = arith.constant 0 : index
    %c0_29 = arith.constant 0 : index
    %49 = vector.load %arg9[%c0_28, %c0_29] : memref<2x128xf32, #tpu.memory_space<vmem>>, vector<2x128xf32>
    tpu.vector_store %arg9[%c0_28, %c0_29], %48 {strides = array<i32>} : memref<2x128xf32, #tpu.memory_space<vmem>>, vector<2x128xf32>,
    return
  }
}

</mosaic_0001>

<bundles_post_ra>
// kernel: mynet_forward.1
= control target key start
LH: loop header
LB: loop body
LE: loop exit
PB: predicated region body
PF: predicated region fallthrough
CT: control target
= control target key end

     0   :  { %14 = vsyncpa [#allocation3], 0  ;;  %s2806_s0 = inlined_call_operand.hbm [shape: f32[2,6], index: 0, kind: input, shape index: {}]   ;;  %s2807_s1 = inlined_call_operand.hbm [shape: bf16[6,1024], index: 1, kind: input, shape index: {}]   ;;  %s2808_s2 = inlined_call_operand.hbm [shape: f32[1,1024], index: 2, kind: input, shape index: {}]   ;;  %s2809_s3 = inlined_call_operand.hbm [shape: bf16[384,128], index: 3, kind: input, shape index: {}]   ;;  %s2810_s4 = inlined_call_operand.vmem [shape: f32[1,128], index: 4, kind: input, shape index: {}]   ;;  %s2811_s5 = inlined_call_operand.hbm [shape: bf16[768,128], index: 5, kind: input, shape index: {}]   ;;  %s2812_s6 = inlined_call_operand.vmem [shape: f32[1,128], index: 6, kind: input, shape index: {}]   ;;  %s2813_s7 = inlined_call_operand.hbm [shape: bf16[128,128], index: 7, kind: input, shape index: {}]   ;;  %s2814_s8 = inlined_call_operand.vmem [shape: f32[1,128], index: 8, kind: input, shape index: {}]   ;;  %s2815_s9 = inlined_call_operand.hbm [shape: f32[2,128], index: 9, kind: output, shape index: {}]  }
   0x1   :  { %15 = vsyncpa [#allocation6], 0 }
   0x2   :  { %16 = vsyncpa [#allocation9], 0 }
   0x3   :  { %17 = vsyncpa [#allocation12], 0 }
   0x4   :  { %18 = vsyncpa [#allocation4], 0  ;;  %s2380_s30 = smov [#allocation5]   ;;  %s2381_s11 = smov [#allocation8]  }
   0x5   :  { %s35_s10 = sshll.u32 %s2380_s30, 4  ;;  %s54_s12 = sshll.u32 %s2381_s11, 4  ;;  %s36_s10 = int_to_ptr.vmem [resolvable:$true] %s35_s10  ;;  %s55_s12 = int_to_ptr.vmem [resolvable:$true] %s54_s12 }
   0x6   :  { %s2238_s13 = scalar_lea.vmem %s36_s10, 512  ;;  %p2243_p1 = scmp.lt.s32.totalorder %s36_s10, %s36_s10 }
   0x7   :  { %p2239_p0 = scmp.ne.s32.totalorder %s36_s10, %s2238_s13  ;;  %p2244_p2 = scmp.lt.s32.totalorder %s2238_s13, %s2238_s13 }
   0x9   :  { %p2245_p3 = por %p2244_p2, %p2243_p1 }
   0xb   :  { %p2246_p4 = pnand %p2245_p3, %p2239_p0 }
   0xd   :  { %2249 = shalt.err (!%p2246_p4)
}
   0xe   :  { %38 = dma.hbm_to_vmem [thread:$0]  %s2807_s1, 512, %s36_s10, [#allocation6]  }
   0xf   :  { %s2258_s16 = scalar_lea.vmem %s55_s12, 3072  ;;  %p2263_p6 = scmp.lt.s32.totalorder %s55_s12, %s55_s12 }
  0x10   :  { %p2259_p5 = scmp.ne.s32.totalorder %s55_s12, %s2258_s16  ;;  %p2264_p7 = scmp.lt.s32.totalorder %s2258_s16, %s2258_s16 }
  0x12   :  { %p2265_p8 = por %p2264_p7, %p2263_p6 }
  0x14   :  { %p2266_p9 = pnand %p2265_p8, %p2259_p5 }
  0x16   :  { %2269 = shalt.err (!%p2266_p9)
}
  0x17   :  { %s2382_s17 = smov 64   ;;  %s2383_s18 = smov 4  }
  0x18   :  { %60 = dma.hbm_to_vmem [thread:$0]  %s2809_s3, 3072, %s55_s12, [#allocation9], %s2382_s17, %s2382_s17, %s2383_s18  }
  0x19   :  { %s2384_s21 = smov [#allocation2]   ;;  %s2385_s23 = smov [#allocation7]  }
  0x1a   :  { %s25_s22 = sshll.u32 %s2384_s21, 4  ;;  %s45_s1 = sshll.u32 %s2385_s23, 4  ;;  %s26_s22 = int_to_ptr.vmem [resolvable:$true] %s25_s22  ;;  %s46_s1 = int_to_ptr.vmem [resolvable:$true] %s45_s1 }
  0x1b   :  { %s2278_s24 = scalar_lea.vmem %s26_s22, 32  ;;  %p2283_p11 = scmp.lt.s32.totalorder %s26_s22, %s26_s22 }
  0x1c   :  { %p2279_p10 = scmp.ne.s32.totalorder %s26_s22, %s2278_s24  ;;  %p2284_p12 = scmp.lt.s32.totalorder %s2278_s24, %s2278_s24 }
  0x1e   :  { %p2285_p13 = por %p2284_p12, %p2283_p11 }
  0x20   :  { %p2286_p0 = pnand %p2285_p13, %p2279_p10 }
  0x22   :  { %2289 = shalt.err (!%p2286_p0)
}
  0x23   :  { %28 = dma.hbm_to_vmem [thread:$0]  %s2806_s0, 32, %s26_s22, [#allocation3]  }
  0x24   :  { %s2298_s27 = scalar_lea.vmem %s46_s1, 128  ;;  %p2303_p2 = scmp.lt.s32.totalorder %s46_s1, %s46_s1 }
  0x25   :  { %p2299_p1 = scmp.ne.s32.totalorder %s46_s1, %s2298_s27  ;;  %p2304_p3 = scmp.lt.s32.totalorder %s2298_s27, %s2298_s27 }
  0x27   :  { %p2305_p4 = por %p2304_p3, %p2303_p2 }
  0x29   :  { %p2306_p5 = pnand %p2305_p4, %p2299_p1 }
  0x2b   :  { %2309 = shalt.err (!%p2306_p5)
}
  0x2c   :  { %48 = dma.hbm_to_vmem [thread:$0]  %s2808_s2, 128, %s46_s1, [#allocation6]  }
  0x2d   :  { %s2386_s29 = smov [#allocation10]   ;;  %s2387_s10 = smov [#allocation11]  }
  0x2e   :  { %s68_s30 = sshll.u32 %s2386_s29, 4  ;;  %s82_s11 = sshll.u32 %s2387_s10, 4  ;;  %s69_s30 = int_to_ptr.vmem [resolvable:$true] %s68_s30  ;;  %s83_s11 = int_to_ptr.vmem [resolvable:$true] %s82_s11 }
  0x2f   :  { %s2318_s12 = scalar_lea.vmem %s69_s30, 6144  ;;  %p2323_p7 = scmp.lt.s32.totalorder %s69_s30, %s69_s30 }
  0x30   :  { %p2319_p6 = scmp.ne.s32.totalorder %s69_s30, %s2318_s12  ;;  %p2324_p8 = scmp.lt.s32.totalorder %s2318_s12, %s2318_s12 }
  0x32   :  { %p2325_p9 = por %p2324_p8, %p2323_p7 }
  0x34   :  { %p2326_p10 = pnand %p2325_p9, %p2319_p6 }
  0x36   :  { %2329 = shalt.err (!%p2326_p10)
}
  0x37   :  { %74 = dma.hbm_to_vmem [thread:$0]  %s2811_s5, 6144, %s69_s30, [#allocation9], %s2382_s17, %s2382_s17, %s2383_s18  }
  0x38   :  { %s2338_s2 = scalar_lea.vmem %s83_s11, 1024  ;;  %p2343_p12 = scmp.lt.s32.totalorder %s83_s11, %s83_s11 }
  0x39   :  { %p2339_p11 = scmp.ne.s32.totalorder %s83_s11, %s2338_s2  ;;  %p2344_p13 = scmp.lt.s32.totalorder %s2338_s2, %s2338_s2 }
  0x3b   :  { %p2345_p0 = por %p2344_p13, %p2343_p12 }
  0x3d   :  { %p2346_p1 = pnand %p2345_p0, %p2339_p11 }
  0x3f   :  { %2349 = shalt.err (!%p2346_p1)
}
  0x40   :  { %88 = dma.hbm_to_vmem [thread:$0]  %s2813_s7, 1024, %s83_s11, [#allocation12], %s2382_s17, %s2382_s17, %s2383_s18  }
  0x41   :  { %2370 = dma.done.wait [#allocation3], 32  }
  0x42   :  { %2371 = vsyncadd [#allocation3], 4294967264 }
  0x43   :  { %2372 = dma.done.wait [#allocation6], 640  }
  0x44   :  { %2373 = vsyncadd [#allocation6], 4294966656 }
  0x45   :  { %2374 = dma.done.wait [#allocation9], 9216  }
  0x46   :  { %2375 = vsyncadd [#allocation9], 4294958080 }
  0x47   :  { %2376 = dma.done.wait [#allocation12], 1024  }
  0x48   :  { %2377 = vsyncadd [#allocation12], 4294966272  ;;  %v2388_v0 = vmov 0.0   ;;  %v111_v1 = vld [vmem:[#allocation5] sm:$0x77]  ;;  %vm181_vm0 = vcmask 1042432   ;;  %v117_v42 = vlaneseq }
  0x49   :  { %238 = vmatprep.mubr.f32.mxu0 %v2388_v0  ;;  %277 = vmatprep.mubr.f32.mxu1 %v2388_v0  ;;  %v112_v2 = vld [vmem:[#allocation5 + $0x8] sm:$0x77]  ;;  %v1666_v3 = vcombine.high %v111_v1, %v111_v1  ;;  %v1665_v5 = vcombine.low %v111_v1, %v111_v1  ;;  %v113_v7 = vld [vmem:[#allocation5 + $0x10] sm:$0x77]  ;;  %v114_v8 = vld [vmem:[#allocation5 + $0x18] sm:$0x77] }
  0x4a   :  { %v1668_v4 = vcombine.high %v112_v2, %v112_v2  ;;  %v1667_v6 = vcombine.low %v112_v2, %v112_v2  ;;  %v1670_v9 = vcombine.high %v113_v7, %v113_v7  ;;  %v1669_v10 = vcombine.low %v113_v7, %v113_v7  ;;  %v110_v15 = vld [vmem:[#allocation2] sm:$0x3]  ;;  %v2478_v18 = vld [vmem:[#allocation8 + $0x78] sm:$0xff]   ;;  %v2501_v24 = vld [vmem:[#allocation8 + $0x68] sm:$0xff]   ;;  %s2390_s19 = smov [#allocation13]  }
  0x4b   :  { %v1672_v11 = vcombine.high %v114_v8, %v114_v8  ;;  %v1671_v12 = vcombine.low %v114_v8, %v114_v8  ;;  %1673 = vmatprep.subr.msk.bf16.mxu0 %vm181_vm0, %v1666_v3  ;;  %v183_v13 = vsel %vm181_vm0, %v1665_v5, 0  ;;  %vm177_vm1 = vcmask 48128   ;;  %v2482_v19 = vld [vmem:[#allocation8 + $0xb8] sm:$0xff]   ;;  %v2488_v21 = vld [vmem:[#allocation8 + $0x70] sm:$0xff]   ;;  %v2504_v25 = vld [vmem:[#allocation8 + $0xa8] sm:$0xff]   ;;  %s1653_s20 = sshll.u32 %s2390_s19, 4  ;;  %s1654_s20 = int_to_ptr.vmem [resolvable:$true] %s1653_s20 }
  0x4c   :  { %1675 = vmatprep.subr.msk.bf16.mxu1 %vm181_vm0, %v1668_v4  ;;  %v189_v14 = vsel %vm181_vm0, %v1667_v6, 0  ;;  %221 = vmatpush1.bf16.msra.mxu0 %v183_v13  ;;  %v195_v16 = vsel %vm181_vm0, %v1669_v10, 0  ;;  %v2485_v20 = vld [vmem:[#allocation8 + $0x38] sm:$0xff]   ;;  %v2493_v22 = vld [vmem:[#allocation8 + $0xb0] sm:$0xff]   ;;  %v2507_v26 = vld [vmem:[#allocation8 + $0x28] sm:$0xff]   ;;  %vm2389_vm2 = vmmov 0   ;;  %p2355_p3 = scmp.lt.s32.totalorder %s1654_s20, %s1654_s20 }
  0x4d   :  { %260 = vmatpush1.bf16.msra.mxu1 %v189_v14  ;;  %1677 = vmatprep.subr.msk.bf16.mxu0 %vm181_vm0, %v1670_v9  ;;  %v201_v17 = vsel %vm181_vm0, %v1671_v12, 0  ;;  %v2497_v23 = vld [vmem:[#allocation8 + $0x30] sm:$0xff]   ;;  %v2511_v27 = vld [vmem:[#allocation8 + $0x60] sm:$0xff]   ;;  %v2521_v30 = vld [vmem:[#allocation8 + $0x58] sm:$0xff]   ;;  %v2568_v43 = vshrl.u32 %v117_v42, 7 }
  0x4e   :  { %1679 = vmatprep.subr.msk.bf16.mxu1 %vm181_vm0, %v1672_v11  ;;  %v2514_v28 = vld [vmem:[#allocation8 + $0xa0] sm:$0xff]   ;;  %v2524_v31 = vld [vmem:[#allocation8 + $0x18] sm:$0xff]   ;;  %v2528_v33 = vld [vmem:[#allocation8 + $0x50] sm:$0xff]  }
  0x4f   :  { %1674 = vmatmul.mubr.msk.f32.vlgmr.msra.gmra.mxu0 %vm177_vm1, %v110_v15  ;;  %v2517_v29 = vld [vmem:[#allocation8 + $0x20] sm:$0xff]   ;;  %v2526_v32 = vld [vmem:[#allocation8 + $0x98] sm:$0xff]   ;;  %v2534_v34 = vld [vmem:[#allocation8 + $0x10] sm:$0xff]   ;;  %v127_v44 = vsub.s32 2, %v2568_v43  ;;  %v119_v46 = vsub.s32 0, %v2568_v43  ;;  %v123_v47 = vsub.s32 1, %v2568_v43 }
  0x50   :  { %1676 = vmatmul.mubr.msk.f32.vlgmr.msra.gmra.mxu1 %vm177_vm1, %v110_v15  ;;  %299 = vmatpush1.bf16.msra.mxu0 %v195_v16  ;;  %v2536_v35 = vld [vmem:[#allocation8 + $0x90] sm:$0xff]   ;;  %v2538_v36 = vld [vmem:[#allocation8 + $0x48] sm:$0xff]   ;;  %v2554_v39 = vld [vmem:[#allocation8 + $0x80] sm:$0xff]   ;;  %v131_v60 = vsub.s32 3, %v2568_v43  ;;  %v135_v2 = vsub.s32 4, %v2568_v43  ;;  %v139_v7 = vsub.s32 5, %v2568_v43 }
  0x51   :  { %316 = vmatprep.mubr.f32.mxu0 %v2388_v0  ;;  %338 = vmatpush1.bf16.msra.mxu1 %v201_v17  ;;  %v2544_v37 = vld [vmem:[#allocation8 + $0x88] sm:$0xff]   ;;  %v2558_v40 = vld [vmem:[#allocation8 + $0x40] sm:$0xff]   ;;  %v2571_v45 = vld [vmem:[#allocation7] sm:$0xff]  ;;  %v143_v12 = vsub.s32 6, %v2568_v43  ;;  %v147_v17 = vsub.s32 7, %v2568_v43 }
  0x52   :  { %355 = vmatprep.mubr.f32.mxu1 %v2388_v0  ;;  %1998 = vmatprep.subr.bf16.mxu1 %v2388_v0  ;;  %v2552_v38 = vld [vmem:[#allocation8 + $0x8] sm:$0xff]   ;;  %v2560_v41 = vld [vmem:[#allocation8] sm:$0xff]   ;;  %v128_v48 = vrot.slane %v2571_v45, %v127_v44  ;;  %v120_v49 = vrot.slane %v2571_v45, %v119_v46  ;;  %v124_v50 = vrot.slane %v2571_v45, %v123_v47  ;;  %v2183_v42 = vld [vmem:[#allocation10 + $0x18] sm:$0xff]  }
  0x53   :  { %1764 = vmatprep.subr.bf16.mxu0 %v2478_v18  ;;  %1678 = vmatmul.mubr.msk.f32.vlgmr.msra.gmra.mxu0 %vm177_vm1, %v110_v15  ;;  %v132_v61 = vrot.slane %v2571_v45, %v131_v60  ;;  %v136_v3 = vrot.slane %v2571_v45, %v135_v2  ;;  %v140_v8 = vrot.slane %v2571_v45, %v139_v7  ;;  %v2184_v43 = vld [vmem:[#allocation10 + $0x50] sm:$0xff]   ;;  %v2186_v47 = vld [vmem:[#allocation10 + $0x48] sm:$0xff]  }
  0x54   :  { %1680 = vmatmul.mubr.msk.f32.vlgmr.msra.gmra.mxu1 %vm177_vm1, %v110_v15  ;;  %1765 = vmatpush3.bf16.msra.mxu0 %v2485_v20  ;;  %v144_v13 = vrot.slane %v2571_v45, %v143_v12  ;;  %v2201_v44 = vld [vmem:[#allocation10 + $0x90] sm:$0xff]   ;;  %v2210_v12 = vld [vmem:[#allocation10 + $0x168] sm:$0xff]  }
  0x55   :  { %1999 = vmatpush3.bf16.msra.mxu1 %v2482_v19  ;;  %1766 = vmatprep.subr.bf16.mxu0 %v2488_v21  ;;  %v2185_v46 = vld [vmem:[#allocation10 + $0x10] sm:$0xff]  }
  0x56   :  { %2000 = vmatprep.subr.bf16.mxu1 %v2388_v0  ;;  %2014 = vmatprep.mubr.msk.f32.mxu1 %vm2389_vm2, %v2388_v0 }
  0x58   :  { %1767 = vmatpush3.bf16.msra.mxu0 %v2497_v23 }
  0x59   :  { %2001 = vmatpush3.bf16.msra.mxu1 %v2493_v22  ;;  %1768 = vmatprep.subr.bf16.mxu0 %v2501_v24 }
  0x5a   :  { %2002 = vmatprep.subr.bf16.mxu1 %v2388_v0 }
  0x5c   :  { %1769 = vmatpush3.bf16.msra.mxu0 %v2507_v26 }
  0x5d   :  { %2003 = vmatpush3.bf16.msra.mxu1 %v2504_v25  ;;  %1770 = vmatprep.subr.bf16.mxu0 %v2511_v27 }
  0x5e   :  { %2004 = vmatprep.subr.bf16.mxu1 %v2388_v0 }
  0x60   :  { %1771 = vmatpush3.bf16.msra.mxu0 %v2517_v29 }
  0x61   :  { %2005 = vmatpush3.bf16.msra.mxu1 %v2514_v28  ;;  %1772 = vmatprep.subr.bf16.mxu0 %v2521_v30 }
  0x62   :  { %2006 = vmatprep.subr.bf16.mxu1 %v2388_v0 }
  0x64   :  { %1773 = vmatpush3.bf16.msra.mxu0 %v2524_v31 }
  0x65   :  { %2007 = vmatpush3.bf16.msra.mxu1 %v2526_v32  ;;  %1774 = vmatprep.subr.bf16.mxu0 %v2528_v33 }
  0x66   :  { %2008 = vmatprep.subr.bf16.mxu1 %v2388_v0 }
  0x68   :  { %1775 = vmatpush3.bf16.msra.mxu0 %v2534_v34 }
  0x69   :  { %2009 = vmatpush3.bf16.msra.mxu1 %v2536_v35  ;;  %1776 = vmatprep.subr.bf16.mxu0 %v2538_v36 }
  0x6a   :  { %2010 = vmatprep.subr.bf16.mxu1 %v2388_v0 }
  0x6c   :  { %1777 = vmatpush3.bf16.msra.mxu0 %v2552_v38 }
  0x6d   :  { %2011 = vmatpush3.bf16.msra.mxu1 %v2544_v37  ;;  %1778 = vmatprep.subr.bf16.mxu0 %v2558_v40 }
  0x6e   :  { %2012 = vmatprep.subr.bf16.mxu1 %v2388_v0 }
  0x70   :  { %1779 = vmatpush3.bf16.msra.mxu0 %v2560_v41 }
  0x71   :  { %2013 = vmatpush3.bf16.msra.mxu1 %v2554_v39  ;;  %1792 = vmatprep.subr.bf16.mxu0 %v2478_v18 }
  0x72   :  { %2017 = vmatprep.subr.bf16.mxu1 %v2388_v0 }
 0x10f   :  { %v240_v51 = vpop.f32.mrf.mxu0 }
 0x110   :  { %v279_v52 = vpop.f32.mrf.mxu1  ;;  %v241_v54 = vadd.f32 %v240_v51, %v120_v49  ;;  %v2204_v49 = vld [vmem:[#allocation10 + $0xc0] sm:$0xff]  }
 0x111   :  { %v280_v53 = vadd.f32 %v279_v52, %v128_v48  ;;  %v242_v55 = vpop.f32.mrf.mxu0  ;;  %v2203_v48 = vld [vmem:[#allocation10 + $0x88] sm:$0xff]   ;;  %v2188_v51 = vld [vmem:[#allocation10 + $0x40] sm:$0xff]  }
 0x112   :  { %v243_v57 = vadd.f32 %v242_v55, %v124_v50  ;;  %v362_v59 = vmax.f32 %v241_v54, 0.0  ;;  %v281_v62 = vpop.f32.mrf.mxu1  ;;  %v2187_v50 = vld [vmem:[#allocation10 + $0x8] sm:$0xff]   ;;  %v2205_v52 = vld [vmem:[#allocation10 + $0x80] sm:$0xff]  }
 0x113   :  { %v2578_v56 = vmax.f32 %v280_v53, 0.0  ;;  %v282_v63 = vadd.f32 %v281_v62, %v132_v61  ;;  %v318_v4 = vpop.f32.mrf.mxu0  ;;  %v2189_v53 = vld [vmem:[#allocation10] sm:$0xff]   ;;  %v2780_v61 = vld [vmem:[%s2810_s4] ss:$0 sm:$0xff] }
 0x114   :  { %v363_v58 = vmax.f32 %v243_v57, 0.0  ;;  %v319_v5 = vadd.f32 %v318_v4, %v136_v3  ;;  %v357_v14 = vpop.f32.mrf.mxu1 }
 0x115   :  { %2015 = vmatmul.mubr.f32.vlgmr.msra.gmra.mxu1 %v2578_v56  ;;  %v2615_v1 = vmax.f32 %v282_v63, 0.0  ;;  %v320_v9 = vpop.f32.mrf.mxu0  ;;  %v358_v15 = vadd.f32 %v357_v14, %v144_v13  ;;  %v2211_v13 = vld [vmem:[#allocation10 + $0x128] sm:$0xff]   ;;  %v2212_v14 = vld [vmem:[#allocation10 + $0x160] sm:$0xff]  }
 0x116   :  { %2018 = vmatpush3.bf16.msra.mxu1 %v2482_v19  ;;  %2033 = vmatprep.mubr.msk.f32.mxu1 %vm2389_vm2, %v2388_v0  ;;  %v2652_v6 = vmax.f32 %v319_v5, 0.0  ;;  %v321_v10 = vadd.f32 %v320_v9, %v140_v8  ;;  %v2207_v8 = vld [vmem:[#allocation10 + $0x138] sm:$0xff]  }
 0x117   :  { %601 = vmatprep.mubr.f32.mxu0 %v363_v58  ;;  %2019 = vmatprep.subr.bf16.mxu1 %v2388_v0  ;;  %v368_v16 = vmax.f32 %v358_v15, 0.0  ;;  %v2213_v15 = vld [vmem:[#allocation10 + $0x120] sm:$0xff]  }
 0x118   :  { %602 = vmatmul.mubr.f32.vlgmr.msra.gmra.mxu0 %v362_v59  ;;  %v2696_v11 = vmax.f32 %v321_v10, 0.0  ;;  %v2208_v10 = vld [vmem:[#allocation10 + $0x170] sm:$0xff]  }
 0x119   :  { %1793 = vmatpush3.bf16.msra.mxu0 %v2485_v20  ;;  %677 = vmatprep.mubr.f32.mxu0 %v2578_v56 }
 0x11a   :  { %2020 = vmatpush3.bf16.msra.mxu1 %v2493_v22  ;;  %1794 = vmatprep.subr.bf16.mxu0 %v2488_v21 }
 0x11b   :  { %2021 = vmatprep.subr.bf16.mxu1 %v2388_v0 }
 0x11d   :  { %1795 = vmatpush3.bf16.msra.mxu0 %v2497_v23 }
 0x11e   :  { %2022 = vmatpush3.bf16.msra.mxu1 %v2504_v25  ;;  %1796 = vmatprep.subr.bf16.mxu0 %v2501_v24 }
 0x11f   :  { %2023 = vmatprep.subr.bf16.mxu1 %v2388_v0 }
 0x121   :  { %1797 = vmatpush3.bf16.msra.mxu0 %v2507_v26 }
 0x122   :  { %2024 = vmatpush3.bf16.msra.mxu1 %v2514_v28  ;;  %1798 = vmatprep.subr.bf16.mxu0 %v2511_v27 }
 0x123   :  { %2025 = vmatprep.subr.bf16.mxu1 %v2388_v0 }
 0x125   :  { %1799 = vmatpush3.bf16.msra.mxu0 %v2517_v29 }
 0x126   :  { %2026 = vmatpush3.bf16.msra.mxu1 %v2526_v32  ;;  %1800 = vmatprep.subr.bf16.mxu0 %v2521_v30 }
 0x127   :  { %2027 = vmatprep.subr.bf16.mxu1 %v2388_v0 }
 0x129   :  { %1801 = vmatpush3.bf16.msra.mxu0 %v2524_v31 }
 0x12a   :  { %2028 = vmatpush3.bf16.msra.mxu1 %v2536_v35  ;;  %1802 = vmatprep.subr.bf16.mxu0 %v2528_v33 }
 0x12b   :  { %2029 = vmatprep.subr.bf16.mxu1 %v2388_v0 }
 0x12d   :  { %1803 = vmatpush3.bf16.msra.mxu0 %v2534_v34 }
 0x12e   :  { %2030 = vmatpush3.bf16.msra.mxu1 %v2544_v37  ;;  %1804 = vmatprep.subr.bf16.mxu0 %v2538_v36 }
 0x12f   :  { %2031 = vmatprep.subr.bf16.mxu1 %v2388_v0 }
 0x131   :  { %1805 = vmatpush3.bf16.msra.mxu0 %v2552_v38 }
 0x132   :  { %2032 = vmatpush3.bf16.msra.mxu1 %v2554_v39  ;;  %1806 = vmatprep.subr.bf16.mxu0 %v2558_v40 }
 0x133   :  { %2036 = vmatprep.subr.bf16.mxu1 %v2388_v0 }
 0x135   :  { %1807 = vmatpush3.bf16.msra.mxu0 %v2560_v41  ;;  %2034 = vmatmul.mubr.f32.vlgmr.msra.gmra.mxu1 %v2615_v1 }
 0x136   :  { %2037 = vmatpush3.bf16.msra.mxu1 %v2482_v19  ;;  %1820 = vmatprep.subr.bf16.mxu0 %v2478_v18 }
 0x137   :  { %2038 = vmatprep.subr.bf16.mxu1 %v2388_v0  ;;  %2052 = vmatprep.mubr.msk.f32.mxu1 %vm2389_vm2, %v2388_v0 }
 0x138   :  { %678 = vmatmul.mubr.f32.vlgmr.msra.gmra.mxu0 %v363_v58 }
 0x139   :  { %1821 = vmatpush3.bf16.msra.mxu0 %v2485_v20  ;;  %753 = vmatprep.mubr.f32.mxu0 %v2615_v1 }
 0x13a   :  { %2039 = vmatpush3.bf16.msra.mxu1 %v2493_v22  ;;  %1822 = vmatprep.subr.bf16.mxu0 %v2488_v21 }
 0x13b   :  { %2040 = vmatprep.subr.bf16.mxu1 %v2388_v0 }
 0x13d   :  { %1823 = vmatpush3.bf16.msra.mxu0 %v2497_v23 }
 0x13e   :  { %2041 = vmatpush3.bf16.msra.mxu1 %v2504_v25  ;;  %1824 = vmatprep.subr.bf16.mxu0 %v2501_v24 }
 0x13f   :  { %2042 = vmatprep.subr.bf16.mxu1 %v2388_v0 }
 0x141   :  { %1825 = vmatpush3.bf16.msra.mxu0 %v2507_v26 }
 0x142   :  { %2043 = vmatpush3.bf16.msra.mxu1 %v2514_v28  ;;  %1826 = vmatprep.subr.bf16.mxu0 %v2511_v27 }
 0x143   :  { %2044 = vmatprep.subr.bf16.mxu1 %v2388_v0 }
 0x145   :  { %1827 = vmatpush3.bf16.msra.mxu0 %v2517_v29 }
 0x146   :  { %2045 = vmatpush3.bf16.msra.mxu1 %v2526_v32  ;;  %1828 = vmatprep.subr.bf16.mxu0 %v2521_v30 }
 0x147   :  { %2046 = vmatprep.subr.bf16.mxu1 %v2388_v0 }
 0x149   :  { %1829 = vmatpush3.bf16.msra.mxu0 %v2524_v31 }
 0x14a   :  { %2047 = vmatpush3.bf16.msra.mxu1 %v2536_v35  ;;  %1830 = vmatprep.subr.bf16.mxu0 %v2528_v33 }
 0x14b   :  { %2048 = vmatprep.subr.bf16.mxu1 %v2388_v0 }
 0x14d   :  { %1831 = vmatpush3.bf16.msra.mxu0 %v2534_v34 }
 0x14e   :  { %2049 = vmatpush3.bf16.msra.mxu1 %v2544_v37  ;;  %1832 = vmatprep.subr.bf16.mxu0 %v2538_v36 }
 0x14f   :  { %2050 = vmatprep.subr.bf16.mxu1 %v2388_v0 }
 0x151   :  { %1833 = vmatpush3.bf16.msra.mxu0 %v2552_v38 }
 0x152   :  { %2051 = vmatpush3.bf16.msra.mxu1 %v2554_v39  ;;  %1834 = vmatprep.subr.bf16.mxu0 %v2558_v40 }
 0x153   :  { %2055 = vmatprep.subr.bf16.mxu1 %v2388_v0 }
 0x155   :  { %1835 = vmatpush3.bf16.msra.mxu0 %v2560_v41  ;;  %2053 = vmatmul.mubr.f32.vlgmr.msra.gmra.mxu1 %v2652_v6 }
 0x156   :  { %2056 = vmatpush3.bf16.msra.mxu1 %v2482_v19  ;;  %1848 = vmatprep.subr.bf16.mxu0 %v2478_v18 }
 0x157   :  { %2057 = vmatprep.subr.bf16.mxu1 %v2388_v0  ;;  %2071 = vmatprep.mubr.msk.f32.mxu1 %vm2389_vm2, %v2388_v0 }
 0x158   :  { %754 = vmatmul.mubr.f32.vlgmr.msra.gmra.mxu0 %v2578_v56  ;;  %v2206_v56 = vld [vmem:[#allocation10 + $0x178] sm:$0xff]  }
 0x159   :  { %1849 = vmatpush3.bf16.msra.mxu0 %v2485_v20  ;;  %829 = vmatprep.mubr.f32.mxu0 %v2652_v6 }
 0x15a   :  { %2058 = vmatpush3.bf16.msra.mxu1 %v2493_v22  ;;  %1850 = vmatprep.subr.bf16.mxu0 %v2488_v21 }
 0x15b   :  { %2059 = vmatprep.subr.bf16.mxu1 %v2388_v0 }
 0x15d   :  { %1851 = vmatpush3.bf16.msra.mxu0 %v2497_v23 }
 0x15e   :  { %2060 = vmatpush3.bf16.msra.mxu1 %v2504_v25  ;;  %1852 = vmatprep.subr.bf16.mxu0 %v2501_v24 }
 0x15f   :  { %2061 = vmatprep.subr.bf16.mxu1 %v2388_v0 }
 0x161   :  { %1853 = vmatpush3.bf16.msra.mxu0 %v2507_v26 }
 0x162   :  { %2062 = vmatpush3.bf16.msra.mxu1 %v2514_v28  ;;  %1854 = vmatprep.subr.bf16.mxu0 %v2511_v27 }
 0x163   :  { %2063 = vmatprep.subr.bf16.mxu1 %v2388_v0 }
 0x165   :  { %1855 = vmatpush3.bf16.msra.mxu0 %v2517_v29 }
 0x166   :  { %2064 = vmatpush3.bf16.msra.mxu1 %v2526_v32  ;;  %1856 = vmatprep.subr.bf16.mxu0 %v2521_v30 }
 0x167   :  { %2065 = vmatprep.subr.bf16.mxu1 %v2388_v0 }
 0x169   :  { %1857 = vmatpush3.bf16.msra.mxu0 %v2524_v31 }
 0x16a   :  { %2066 = vmatpush3.bf16.msra.mxu1 %v2536_v35  ;;  %1858 = vmatprep.subr.bf16.mxu0 %v2528_v33 }
 0x16b   :  { %2067 = vmatprep.subr.bf16.mxu1 %v2388_v0 }
 0x16d   :  { %1859 = vmatpush3.bf16.msra.mxu0 %v2534_v34 }
 0x16e   :  { %2068 = vmatpush3.bf16.msra.mxu1 %v2544_v37  ;;  %1860 = vmatprep.subr.bf16.mxu0 %v2538_v36 }
 0x16f   :  { %2069 = vmatprep.subr.bf16.mxu1 %v2388_v0 }
 0x171   :  { %1861 = vmatpush3.bf16.msra.mxu0 %v2552_v38 }
 0x172   :  { %2070 = vmatpush3.bf16.msra.mxu1 %v2554_v39  ;;  %1862 = vmatprep.subr.bf16.mxu0 %v2558_v40 }
 0x173   :  { %2074 = vmatprep.subr.bf16.mxu1 %v2388_v0 }
 0x175   :  { %1863 = vmatpush3.bf16.msra.mxu0 %v2560_v41  ;;  %2072 = vmatmul.mubr.f32.vlgmr.msra.gmra.mxu1 %v2696_v11 }
 0x176   :  { %2075 = vmatpush3.bf16.msra.mxu1 %v2482_v19  ;;  %1876 = vmatprep.subr.bf16.mxu0 %v2478_v18 }
 0x177   :  { %2076 = vmatprep.subr.bf16.mxu1 %v2388_v0  ;;  %2090 = vmatprep.mubr.msk.f32.mxu1 %vm2389_vm2, %v2388_v0 }
 0x178   :  { %830 = vmatmul.mubr.f32.vlgmr.msra.gmra.mxu0 %v2615_v1 }
 0x179   :  { %1877 = vmatpush3.bf16.msra.mxu0 %v2485_v20  ;;  %905 = vmatprep.mubr.f32.mxu0 %v2696_v11 }
 0x17a   :  { %2077 = vmatpush3.bf16.msra.mxu1 %v2493_v22  ;;  %1878 = vmatprep.subr.bf16.mxu0 %v2488_v21 }
 0x17b   :  { %2078 = vmatprep.subr.bf16.mxu1 %v2388_v0 }
 0x17d   :  { %1879 = vmatpush3.bf16.msra.mxu0 %v2497_v23 }
 0x17e   :  { %2079 = vmatpush3.bf16.msra.mxu1 %v2504_v25  ;;  %1880 = vmatprep.subr.bf16.mxu0 %v2501_v24 }
 0x17f   :  { %2080 = vmatprep.subr.bf16.mxu1 %v2388_v0 }
 0x181   :  { %1881 = vmatpush3.bf16.msra.mxu0 %v2507_v26 }
 0x182   :  { %2081 = vmatpush3.bf16.msra.mxu1 %v2514_v28  ;;  %1882 = vmatprep.subr.bf16.mxu0 %v2511_v27 }
 0x183   :  { %2082 = vmatprep.subr.bf16.mxu1 %v2388_v0 }
 0x185   :  { %1883 = vmatpush3.bf16.msra.mxu0 %v2517_v29 }
 0x186   :  { %2083 = vmatpush3.bf16.msra.mxu1 %v2526_v32  ;;  %1884 = vmatprep.subr.bf16.mxu0 %v2521_v30 }
 0x187   :  { %2084 = vmatprep.subr.bf16.mxu1 %v2388_v0 }
 0x189   :  { %1885 = vmatpush3.bf16.msra.mxu0 %v2524_v31 }
 0x18a   :  { %2085 = vmatpush3.bf16.msra.mxu1 %v2536_v35  ;;  %1886 = vmatprep.subr.bf16.mxu0 %v2528_v33 }
 0x18b   :  { %2086 = vmatprep.subr.bf16.mxu1 %v2388_v0 }
 0x18d   :  { %1887 = vmatpush3.bf16.msra.mxu0 %v2534_v34 }
 0x18e   :  { %2087 = vmatpush3.bf16.msra.mxu1 %v2544_v37  ;;  %1888 = vmatprep.subr.bf16.mxu0 %v2538_v36 }
 0x18f   :  { %2088 = vmatprep.subr.bf16.mxu1 %v2388_v0 }
 0x191   :  { %1889 = vmatpush3.bf16.msra.mxu0 %v2552_v38 }
 0x192   :  { %2089 = vmatpush3.bf16.msra.mxu1 %v2554_v39  ;;  %1890 = vmatprep.subr.bf16.mxu0 %v2558_v40 }
 0x193   :  { %2093 = vmatprep.subr.bf16.mxu1 %v2388_v0 }
 0x195   :  { %1891 = vmatpush3.bf16.msra.mxu0 %v2560_v41  ;;  %2091 = vmatmul.mubr.f32.vlgmr.msra.gmra.mxu1 %v368_v16 }
 0x196   :  { %2094 = vmatpush3.bf16.msra.mxu1 %v2482_v19  ;;  %1904 = vmatprep.subr.bf16.mxu0 %v2478_v18  ;;  %v148_v18 = vrot.slane %v2571_v45, %v147_v17  ;;  %v359_v19 = vpop.f32.mrf.mxu1  ;;  %v2202_v45 = vld [vmem:[#allocation10 + $0xc8] sm:$0xff]   ;;  %v2215_v17 = vld [vmem:[#allocation10 + $0x118] sm:$0xff]  }
 0x197   :  { %2095 = vmatprep.subr.bf16.mxu1 %v2388_v0  ;;  %2109 = vmatprep.mubr.msk.f32.mxu1 %vm2389_vm2, %v2388_v0 }
 0x198   :  { %906 = vmatmul.mubr.f32.vlgmr.msra.gmra.mxu0 %v2652_v6 }
 0x199   :  { %1905 = vmatpush3.bf16.msra.mxu0 %v2485_v20  ;;  %981 = vmatprep.mubr.f32.mxu0 %v368_v16  ;;  %v360_v20 = vadd.f32 %v359_v19, %v148_v18  ;;  %v2214_v16 = vld [vmem:[#allocation10 + $0x158] sm:$0xff]   ;;  %v2216_v18 = vld [vmem:[#allocation10 + $0x150] sm:$0xff]  }
 0x19a   :  { %2096 = vmatpush3.bf16.msra.mxu1 %v2493_v22  ;;  %1906 = vmatprep.subr.bf16.mxu0 %v2488_v21  ;;  %v2190_v21 = vld [vmem:[#allocation10 + $0xf8] sm:$0xff]  }
 0x19b   :  { %2097 = vmatprep.subr.bf16.mxu1 %v2388_v0  ;;  %v2174_v22 = vld [vmem:[#allocation10 + $0x78] sm:$0xff]  }
 0x19d   :  { %1907 = vmatpush3.bf16.msra.mxu0 %v2497_v23  ;;  %v2191_v23 = vld [vmem:[#allocation10 + $0xb8] sm:$0xff]  }
 0x19e   :  { %2098 = vmatpush3.bf16.msra.mxu1 %v2504_v25  ;;  %1908 = vmatprep.subr.bf16.mxu0 %v2501_v24  ;;  %v369_v24 = vmax.f32 %v360_v20, 0.0  ;;  %v2192_v25 = vld [vmem:[#allocation10 + $0xf0] sm:$0xff]  }
 0x19f   :  { %2099 = vmatprep.subr.bf16.mxu1 %v2388_v0  ;;  %v2217_v20 = vld [vmem:[#allocation10 + $0x110] sm:$0xff]  }
 0x1a1   :  { %1909 = vmatpush3.bf16.msra.mxu0 %v2507_v26  ;;  %v2175_v26 = vld [vmem:[#allocation10 + $0x38] sm:$0xff]  }
 0x1a2   :  { %2100 = vmatpush3.bf16.msra.mxu1 %v2514_v28  ;;  %1910 = vmatprep.subr.bf16.mxu0 %v2511_v27  ;;  %v2176_v27 = vld [vmem:[#allocation10 + $0x70] sm:$0xff]  }
 0x1a3   :  { %2101 = vmatprep.subr.bf16.mxu1 %v2388_v0  ;;  %v2193_v28 = vld [vmem:[#allocation10 + $0xb0] sm:$0xff]  }
 0x1a5   :  { %1911 = vmatpush3.bf16.msra.mxu0 %v2517_v29  ;;  %v2194_v29 = vld [vmem:[#allocation10 + $0xe8] sm:$0xff]  }
 0x1a6   :  { %2102 = vmatpush3.bf16.msra.mxu1 %v2526_v32  ;;  %1912 = vmatprep.subr.bf16.mxu0 %v2521_v30  ;;  %v2177_v30 = vld [vmem:[#allocation10 + $0x30] sm:$0xff]   ;;  %v2195_v32 = vld [vmem:[#allocation10 + $0xa8] sm:$0xff]  }
 0x1a7   :  { %2103 = vmatprep.subr.bf16.mxu1 %v2388_v0 }
 0x1a9   :  { %1913 = vmatpush3.bf16.msra.mxu0 %v2524_v31  ;;  %v2178_v31 = vld [vmem:[#allocation10 + $0x68] sm:$0xff]  }
 0x1aa   :  { %2104 = vmatpush3.bf16.msra.mxu1 %v2536_v35  ;;  %1914 = vmatprep.subr.bf16.mxu0 %v2528_v33  ;;  %v2196_v33 = vld [vmem:[#allocation10 + $0xe0] sm:$0xff]  }
 0x1ab   :  { %2105 = vmatprep.subr.bf16.mxu1 %v2388_v0  ;;  %v2180_v35 = vld [vmem:[#allocation10 + $0x60] sm:$0xff]  }
 0x1ad   :  { %1915 = vmatpush3.bf16.msra.mxu0 %v2534_v34  ;;  %v2179_v34 = vld [vmem:[#allocation10 + $0x28] sm:$0xff]  }
 0x1ae   :  { %2106 = vmatpush3.bf16.msra.mxu1 %v2544_v37  ;;  %1916 = vmatprep.subr.bf16.mxu0 %v2538_v36  ;;  %v2197_v36 = vld [vmem:[#allocation10 + $0xa0] sm:$0xff]   ;;  %v2198_v37 = vld [vmem:[#allocation10 + $0xd8] sm:$0xff]  }
 0x1af   :  { %2107 = vmatprep.subr.bf16.mxu1 %v2388_v0 }
 0x1b1   :  { %1917 = vmatpush3.bf16.msra.mxu0 %v2552_v38  ;;  %v2181_v38 = vld [vmem:[#allocation10 + $0x20] sm:$0xff]  }
 0x1b2   :  { %2108 = vmatpush3.bf16.msra.mxu1 %v2554_v39  ;;  %1918 = vmatprep.subr.bf16.mxu0 %v2558_v40  ;;  %v2182_v39 = vld [vmem:[#allocation10 + $0x58] sm:$0xff]  }
 0x1b3   :  { %1951 = vmatprep.subr.bf16.mxu1 %v2190_v21  ;;  %v2199_v40 = vld [vmem:[#allocation10 + $0x98] sm:$0xff]   ;;  %v2218_v21 = vld [vmem:[#allocation10 + $0x148] sm:$0xff]  }
 0x1b5   :  { %1919 = vmatpush3.bf16.msra.mxu0 %v2560_v41  ;;  %2110 = vmatmul.mubr.f32.vlgmr.msra.gmra.mxu1 %v369_v24  ;;  %v2200_v41 = vld [vmem:[#allocation10 + $0xd0] sm:$0xff]   ;;  %v2220_v24 = vld [vmem:[#allocation10 + $0x140] sm:$0xff]  }
 0x1b6   :  { %1932 = vmatprep.subr.bf16.mxu0 %v2174_v22  ;;  %1952 = vmatpush3.bf16.msra.mxu1 %v2191_v23  ;;  %v2219_v23 = vld [vmem:[#allocation10 + $0x108] sm:$0xff]  }
 0x1b7   :  { %1953 = vmatprep.subr.bf16.mxu1 %v2192_v25  ;;  %v2221_v25 = vld [vmem:[#allocation10 + $0x100] sm:$0xff]  }
 0x1b8   :  { %982 = vmatmul.mubr.f32.vlgmr.msra.gmra.mxu0 %v2696_v11  ;;  %v2209_v11 = vld [vmem:[#allocation10 + $0x130] sm:$0xff]  }
 0x1b9   :  { %1933 = vmatpush3.bf16.msra.mxu0 %v2175_v26 }
 0x1ba   :  { %1934 = vmatprep.subr.bf16.mxu0 %v2176_v27  ;;  %1954 = vmatpush3.bf16.msra.mxu1 %v2193_v28 }
 0x1bb   :  { %1955 = vmatprep.subr.bf16.mxu1 %v2194_v29 }
 0x1bd   :  { %1935 = vmatpush3.bf16.msra.mxu0 %v2177_v30 }
 0x1be   :  { %1936 = vmatprep.subr.bf16.mxu0 %v2178_v31  ;;  %1956 = vmatpush3.bf16.msra.mxu1 %v2195_v32 }
 0x1bf   :  { %1957 = vmatprep.subr.bf16.mxu1 %v2196_v33 }
 0x1c1   :  { %1937 = vmatpush3.bf16.msra.mxu0 %v2179_v34 }
 0x1c2   :  { %1938 = vmatprep.subr.bf16.mxu0 %v2180_v35  ;;  %1958 = vmatpush3.bf16.msra.mxu1 %v2197_v36 }
 0x1c3   :  { %1959 = vmatprep.subr.bf16.mxu1 %v2198_v37 }
 0x1c5   :  { %1939 = vmatpush3.bf16.msra.mxu0 %v2181_v38 }
 0x1c6   :  { %1940 = vmatprep.subr.bf16.mxu0 %v2182_v39  ;;  %1960 = vmatpush3.bf16.msra.mxu1 %v2199_v40 }
 0x1c7   :  { %1961 = vmatprep.subr.bf16.mxu1 %v2200_v41 }
 0x1c9   :  { %1941 = vmatpush3.bf16.msra.mxu0 %v2183_v42 }
 0x1ca   :  { %1942 = vmatprep.subr.bf16.mxu0 %v2184_v43  ;;  %1962 = vmatpush3.bf16.msra.mxu1 %v2201_v44 }
 0x1cb   :  { %1963 = vmatprep.subr.bf16.mxu1 %v2202_v45 }
 0x1cd   :  { %1943 = vmatpush3.bf16.msra.mxu0 %v2185_v46 }
 0x1ce   :  { %1944 = vmatprep.subr.bf16.mxu0 %v2186_v47  ;;  %1964 = vmatpush3.bf16.msra.mxu1 %v2203_v48 }
 0x1cf   :  { %1965 = vmatprep.subr.bf16.mxu1 %v2204_v49 }
 0x1d1   :  { %1945 = vmatpush3.bf16.msra.mxu0 %v2187_v50 }
 0x1d2   :  { %1946 = vmatprep.subr.bf16.mxu0 %v2188_v51  ;;  %1966 = vmatpush3.bf16.msra.mxu1 %v2205_v52 }
 0x1d3   :  { %2112 = vmatprep.subr.bf16.mxu1 %v2388_v0 }
 0x1d5   :  { %v641_v54 = vpop.f32.mrf.mxu1  ;;  %1947 = vmatpush3.bf16.msra.mxu0 %v2189_v53 }
 0x1d6   :  { %1970 = vmatprep.subr.bf16.mxu0 %v2206_v56  ;;  %v2222_v56 = vld [vmem:[#allocation11 + $0x38] sm:$0xff]  }
 0x1d7   :  { %v2016_v55 = vpop.f32.mrf.mxu1 }
 0x1d8   :  { %v1780_v57 = vpop.f32.mrf.mxu0 }
 0x1da   :  { %v1781_v58 = vpop.f32.mrf.mxu0 }
 0x1db   :  { %v1782_v60 = vadd.f32 %v1781_v58, %v1780_v57  ;;  %v2223_v57 = vld [vmem:[#allocation11 + $0x30] sm:$0xff]   ;;  %v2224_v58 = vld [vmem:[#allocation11 + $0x28] sm:$0xff]  }
 0x1dd   :  { %v604_v1 = vadd.f32 %v1782_v60, %v2780_v61  ;;  %v2226_v60 = vld [vmem:[#allocation11 + $0x18] sm:$0xff]  }
 0x1df   :  { %v642_v5 = vadd.f32 %v641_v54, %v604_v1 }
 0x1e1   :  { %v1025_v9 = vmax.f32 %v642_v5, 0.0 }
 0x1f5   :  { %v717_v59 = vpop.f32.mrf.mxu1 }
 0x1f7   :  { %v2035_v62 = vpop.f32.mrf.mxu1 }
 0x1f8   :  { %v1808_v63 = vpop.f32.mrf.mxu0  ;;  %v2228_v62 = vld [vmem:[#allocation11 + $0x8] sm:$0xff]  }
 0x1fa   :  { %v1809_v2 = vpop.f32.mrf.mxu0 }
 0x1fb   :  { %v1810_v3 = vadd.f32 %v1809_v2, %v1808_v63  ;;  %v2229_v63 = vld [vmem:[#allocation11] sm:$0xff]  }
 0x1fd   :  { %v680_v4 = vadd.f32 %v1810_v3, %v2780_v61 }
 0x1ff   :  { %v718_v6 = vadd.f32 %v717_v59, %v680_v4  ;;  %v2225_v59 = vld [vmem:[#allocation11 + $0x20] sm:$0xff]  }
 0x201   :  { %v1026_v7 = vmax.f32 %v718_v6, 0.0  ;;  %v1706_v6 = vld [vmem:[%s2812_s6] ss:$0 sm:$0xff]  ;;  %s2350_s6 = scalar_lea.vmem %s1654_s20, 32 }
 0x202   :  { %p2351_p2 = scmp.ne.s32.totalorder %s1654_s20, %s2350_s6  ;;  %p2356_p4 = scmp.lt.s32.totalorder %s2350_s6, %s2350_s6 }
 0x203   :  { %1454 = vmatprep.mubr.f32.mxu0 %v1026_v7 }
 0x204   :  { %1455 = vmatmul.mubr.f32.vlgmr.msra.gmra.mxu0 %v1025_v9  ;;  %p2357_p5 = por %p2356_p4, %p2355_p3 }
 0x205   :  { %1971 = vmatpush3.bf16.msra.mxu0 %v2207_v8 }
 0x206   :  { %1972 = vmatprep.subr.bf16.mxu0 %v2208_v10  ;;  %p2358_p6 = pnand %p2357_p5, %p2351_p2 }
 0x209   :  { %1973 = vmatpush3.bf16.msra.mxu0 %v2209_v11 }
 0x20a   :  { %1974 = vmatprep.subr.bf16.mxu0 %v2210_v12 }
 0x20d   :  { %1975 = vmatpush3.bf16.msra.mxu0 %v2211_v13 }
 0x20e   :  { %1976 = vmatprep.subr.bf16.mxu0 %v2212_v14 }
 0x211   :  { %1977 = vmatpush3.bf16.msra.mxu0 %v2213_v15 }
 0x212   :  { %1978 = vmatprep.subr.bf16.mxu0 %v2214_v16 }
 0x215   :  { %v793_v19 = vpop.f32.mrf.mxu1  ;;  %1979 = vmatpush3.bf16.msra.mxu0 %v2215_v17 }
 0x216   :  { %1980 = vmatprep.subr.bf16.mxu0 %v2216_v18 }
 0x217   :  { %v2054_v22 = vpop.f32.mrf.mxu1 }
 0x218   :  { %v1836_v26 = vpop.f32.mrf.mxu0 }
 0x219   :  { %1981 = vmatpush3.bf16.msra.mxu0 %v2217_v20 }
 0x21a   :  { %1982 = vmatprep.subr.bf16.mxu0 %v2218_v21  ;;  %v1837_v27 = vpop.f32.mrf.mxu0 }
 0x21b   :  { %v1838_v29 = vadd.f32 %v1837_v27, %v1836_v26 }
 0x21d   :  { %1983 = vmatpush3.bf16.msra.mxu0 %v2219_v23  ;;  %v756_v32 = vadd.f32 %v1838_v29, %v2780_v61 }
 0x21e   :  { %1984 = vmatprep.subr.bf16.mxu0 %v2220_v24 }
 0x21f   :  { %v794_v36 = vadd.f32 %v793_v19, %v756_v32 }
 0x221   :  { %1985 = vmatpush3.bf16.msra.mxu0 %v2221_v25  ;;  %v1027_v39 = vmax.f32 %v794_v36, 0.0 }
 0x235   :  { %v869_v28 = vpop.f32.mrf.mxu1 }
 0x237   :  { %v2073_v30 = vpop.f32.mrf.mxu1 }
 0x238   :  { %v1864_v31 = vpop.f32.mrf.mxu0 }
 0x23a   :  { %v1865_v33 = vpop.f32.mrf.mxu0 }
 0x23b   :  { %v1866_v34 = vadd.f32 %v1865_v33, %v1864_v31 }
 0x23d   :  { %v832_v35 = vadd.f32 %v1866_v34, %v2780_v61 }
 0x23f   :  { %v870_v37 = vadd.f32 %v869_v28, %v832_v35 }
 0x241   :  { %v1028_v38 = vmax.f32 %v870_v37, 0.0 }
 0x243   :  { %1492 = vmatprep.mubr.f32.mxu1 %v1028_v38 }
 0x244   :  { %1493 = vmatmul.mubr.f32.vlgmr.msra.gmra.mxu1 %v1027_v39 }
 0x245   :  { %2128 = vmatprep.mubr.msk.f32.mxu1 %vm2389_vm2, %v2388_v0  ;;  %2113 = vmatpush3.bf16.msra.mxu1 %v2222_v56 }
 0x246   :  { %2114 = vmatprep.subr.bf16.mxu1 %v2388_v0 }
 0x249   :  { %2115 = vmatpush3.bf16.msra.mxu1 %v2223_v57 }
 0x24a   :  { %2116 = vmatprep.subr.bf16.mxu1 %v2388_v0 }
 0x24d   :  { %2117 = vmatpush3.bf16.msra.mxu1 %v2224_v58 }
 0x24e   :  { %2118 = vmatprep.subr.bf16.mxu1 %v2388_v0 }
 0x251   :  { %2119 = vmatpush3.bf16.msra.mxu1 %v2225_v59 }
 0x252   :  { %2120 = vmatprep.subr.bf16.mxu1 %v2388_v0 }
 0x255   :  { %v945_v40 = vpop.f32.mrf.mxu1  ;;  %2121 = vmatpush3.bf16.msra.mxu1 %v2226_v60 }
 0x256   :  { %2122 = vmatprep.subr.bf16.mxu1 %v2388_v0 }
 0x257   :  { %v2092_v41 = vpop.f32.mrf.mxu1 }
 0x258   :  { %v1892_v42 = vpop.f32.mrf.mxu0 }
 0x25a   :  { %v1893_v43 = vpop.f32.mrf.mxu0 }
 0x25b   :  { %v1894_v45 = vadd.f32 %v1893_v43, %v1892_v42 }
 0x25d   :  { %v908_v48 = vadd.f32 %v1894_v45, %v2780_v61 }
 0x25f   :  { %v946_v52 = vadd.f32 %v945_v40, %v908_v48 }
 0x261   :  { %v1029_v55 = vmax.f32 %v946_v52, 0.0 }
 0x275   :  { %v1021_v44 = vpop.f32.mrf.mxu1 }
 0x277   :  { %v2111_v46 = vpop.f32.mrf.mxu1 }
 0x278   :  { %v1920_v47 = vpop.f32.mrf.mxu0 }
 0x27a   :  { %v1921_v49 = vpop.f32.mrf.mxu0 }
 0x27b   :  { %v1922_v50 = vadd.f32 %v1921_v49, %v1920_v47 }
 0x27d   :  { %v984_v51 = vadd.f32 %v1922_v50, %v2780_v61  ;;  %v2227_v61 = vld [vmem:[#allocation11 + $0x10] sm:$0xff]  }
 0x27e   :  { %2123 = vmatpush3.bf16.msra.mxu1 %v2227_v61 }
 0x27f   :  { %v1022_v53 = vadd.f32 %v1021_v44, %v984_v51  ;;  %2124 = vmatprep.subr.bf16.mxu1 %v2388_v0 }
 0x281   :  { %v1030_v54 = vmax.f32 %v1022_v53, 0.0 }
 0x282   :  { %2125 = vmatpush3.bf16.msra.mxu1 %v2228_v62 }
 0x283   :  { %1530 = vmatprep.mubr.f32.mxu0 %v1030_v54  ;;  %2126 = vmatprep.subr.bf16.mxu1 %v2388_v0  ;;  %v1755_v0 = vld [vmem:[%s2814_s8] ss:$0 sm:$0xff] }
 0x284   :  { %1531 = vmatmul.mubr.f32.vlgmr.msra.gmra.mxu0 %v1029_v55 }
 0x286   :  { %2127 = vmatpush3.bf16.msra.mxu1 %v2229_v63 }
 0x2c4   :  { %v1948_v1 = vpop.f32.mrf.mxu0 }
 0x2c6   :  { %v1949_v3 = vpop.f32.mrf.mxu0 }
 0x2c7   :  { %v1950_v5 = vadd.f32 %v1949_v3, %v1948_v1 }
 0x2c9   :  { %v1457_v9 = vadd.f32 %v1950_v5, %v1706_v6 }
 0x304   :  { %v1967_v2 = vpop.f32.mrf.mxu1 }
 0x306   :  { %v1968_v4 = vpop.f32.mrf.mxu1 }
 0x307   :  { %v1969_v7 = vadd.f32 %v1968_v4, %v1967_v2 }
 0x309   :  { %v1495_v11 = vadd.f32 %v1969_v7, %v1457_v9 }
 0x344   :  { %v1986_v8 = vpop.f32.mrf.mxu0 }
 0x346   :  { %v1987_v10 = vpop.f32.mrf.mxu0 }
 0x347   :  { %v1988_v12 = vadd.f32 %v1987_v10, %v1986_v8 }
 0x349   :  { %v1533_v13 = vadd.f32 %v1988_v12, %v1495_v11 }
 0x34b   :  { %v1536_v14 = vmax.f32 %v1533_v13, 0.0 }
 0x34d   :  { %2129 = vmatmul.mubr.f32.vlgmr.msra.gmra.mxu1 %v1536_v14 }
 0x40d   :  { %v1642_v15 = vpop.f32.mrf.mxu1 }
 0x40e   :  { %v1643_v16 = vadd.f32 %v1755_v0, %v1642_v15 }
 0x40f   :  { %v2130_v17 = vpop.f32.mrf.mxu1 }
 0x410   :  { %1646 = vst [vmem:[#allocation13] sm:$0x3] %v1643_v16 }
 0x411   :  { %2361 = shalt.err (!%p2358_p6)
}
 0x412   :  { %1656 = dma.vmem_to_hbm [thread:$0]  %s1654_s20, 32, %s2815_s9, [#allocation4]  }
 0x413   :  { %2378 = dma.done.wait [#allocation4], 32  }
 0x414   :  { %2379 = vsyncadd [#allocation4], 4294967264 }
 0x415   :  { %1660 = vsyncpa [#allocation3], 1 }
 0x416   :  { %1661 = vsyncpa [#allocation6], 1 }
 0x417   :  { %1662 = vsyncpa [#allocation9], 1 }
 0x418   :  { %1663 = vsyncpa [#allocation12], 1 }
 0x419   :  { %1664 = vsyncpa [#allocation4], 1 }

</bundles_post_ra>
